<compile_context>
chip_gen: v6e
topology: v6e:2x2x1
jax: 0.10.0
libtpu: 0.0.40
codegen_flags: <defaults>
</compile_context>

<pallas_src>
import functools

import jax
import jax.numpy as jnp
from jax import lax
from jax.experimental import pallas as pl
from jax.experimental.pallas import tpu as pltpu


# ----------------------------- Pallas kernel ---------------------------------

def _bigru_kernel(gin_ref, whh_ref, bhh_n_ref, out_ref, hfin_ref, h_scr,
                  *, tt, hdim, n_blocks, seq_len, padded, unroll):
    """One grid step = `tt` recurrence steps of one direction.

    gin_ref  : (tt, B, 3H) stream dtype  precomputed x@W_ih + folded biases, gate order [r|z|n]
    whh_ref  : (H, 3H)     recurrent dtype (bf16 by default)
    bhh_n_ref: (1, H)      f32  hidden bias of the n gate (must stay inside r*(...))
    out_ref  : (tt, B, H)  f32  this direction's lane-half of the output time block
    hfin_ref : (B, H)      f32  final hidden of this direction (VMEM-resident across g)
    h_scr    : (2, B, H)   f32  carried hidden state, one slot per direction
    """
    d = pl.program_id(0)          # direction: 0 = forward, 1 = backward
    g = pl.program_id(1)          # block index along this direction's recurrence order

    @pl.when(g == 0)
    def _():
        h_scr[d] = jnp.zeros(h_scr.shape[1:], h_scr.dtype)

    whh = whh_ref[...]            # (H, 3H)
    bhh_n = bhh_n_ref[...]        # (1, H)

    def step(i, h):
        # row inside this time block: i for forward, tt-1-i for backward
        row = i + d * (tt - 1 - 2 * i)
        gi = gin_ref[row].astype(jnp.float32)                     # (B, 3H)
        # single fused recurrent matmul per step (bf16 operands, f32 accumulation)
        gh = jnp.dot(h.astype(whh.dtype), whh,
                     preferred_element_type=jnp.float32)          # (B, 3H)
        r = jax.nn.sigmoid(gi[:, :hdim] + gh[:, :hdim])
        z = jax.nn.sigmoid(gi[:, hdim:2 * hdim] + gh[:, hdim:2 * hdim])
        n = jnp.tanh(gi[:, 2 * hdim:] + r * (gh[:, 2 * hdim:] + bhh_n))
        h_new = (1.0 - z) * n + z * h
        if padded:
            # freeze the hidden state on padded timesteps (t >= true sequence length)
            t_block = g + d * (n_blocks - 1 - 2 * g)
            t_global = t_block * tt + row
            h_new = jnp.where(t_global < seq_len, h_new, h)
        out_ref[row] = h_new
        return h_new

    h_last = lax.fori_loop(0, tt, step, h_scr[d], unroll=unroll)
    h_scr[d] = h_last
    hfin_ref[...] = h_last


# ------------------------------- wrapper --------------------------------------

@functools.partial(jax.jit,
                   static_argnames=("recurrent_dtype", "max_time_block", "vmem_budget_bytes"))
def encoder_forward(tokens, params, *, recurrent_dtype=jnp.bfloat16,
                    max_time_block=64, vmem_budget_bytes=48 * 1024 * 1024):
    """tokens: (T, B) int32.  Returns (outputs (T, B, 2H) f32, hidden (B, D) f32)."""
    T, B = tokens.shape
    H = params["whh"].shape[-1] // 3
    D = params["wfc"].shape[-1]

    # ---- time-block selection from the VMEM budget (feedback: tile as big as fits) ----
    gin_bytes = jnp.dtype(recurrent_dtype).itemsize
    per_step = 2 * (B * 3 * H * gin_bytes) + 2 * (B * H * 4)     # dbl-buffered gin + out
    resident = 2 * H * 3 * H * gin_bytes + 8 * B * H * 4 + (1 << 20)
    avail = max(vmem_budget_bytes - resident, per_step)
    tt = int(max(1, min(avail // per_step, max_time_block, T)))
    G = pl.cdiv(T, tt)
    T_pad = G * tt
    padded = (T_pad != T)
    if padded:
        tokens = jnp.pad(tokens, ((0, T_pad - T), (0, 0)))       # pad with token 0 (cheap)

    embedded = jnp.take(params["embedding"], tokens, axis=0)     # (T_pad, B, E) f32
    # TODO(synk): nn.Dropout is identity in eval mode; training-mode dropout mask not implemented.

    # ---- hoisted input projection; biases folded; stream stored in recurrent dtype ----
    bih, bhh = params["bih"], params["bhh"]                      # (2, 3H) each
    bfold = bih + jnp.concatenate(
        [bhh[:, :2 * H], jnp.zeros_like(bhh[:, 2 * H:])], axis=-1)
    gates_in = jnp.einsum("tbe,deh->dtbh", embedded, params["wih"])
    gates_in = (gates_in + bfold[:, None, None, :]).astype(recurrent_dtype)  # (2,T_pad,B,3H)
    bhh_n = bhh[:, 2 * H:].reshape(2, 1, H).astype(jnp.float32)  # (2, 1, H)
    whh = params["whh"].astype(recurrent_dtype)                  # (2, H, 3H)

    def tb(d, g):
        # forward direction processes time block g; backward processes block G-1-g
        return g + d * (G - 1 - 2 * g)

    # Direct PyTorch-layout output (T, B, 2H): fwd writes lanes [0:H), bwd writes [H:2H).
    # Needs H % 128 == 0 for lane-aligned blocks; otherwise fall back to stacked + concat.
    direct = (H % 128 == 0)
    if direct:
        out_shape_main = jax.ShapeDtypeStruct((T_pad, B, 2 * H), jnp.float32)
        out_spec_main = pl.BlockSpec((tt, B, H), lambda d, g: (tb(d, g), 0, d))
    else:
        out_shape_main = jax.ShapeDtypeStruct((2, T_pad, B, H), jnp.float32)
        out_spec_main = pl.BlockSpec((None, tt, B, H), lambda d, g: (d, tb(d, g), 0, 0))

    kernel = functools.partial(_bigru_kernel, tt=tt, hdim=H, n_blocks=G,
                               seq_len=T, padded=padded, unroll=min(tt, 8))

    out, h_final = pl.pallas_call(
        kernel,
        out_shape=(out_shape_main,
                   jax.ShapeDtypeStruct((2, B, H), jnp.float32)),
        grid_spec=pltpu.PrefetchScalarGridSpec(
            num_scalar_prefetch=0,
            grid=(2, G),
            in_specs=[
                pl.BlockSpec((None, tt, B, 3 * H), lambda d, g: (d, tb(d, g), 0, 0)),
                pl.BlockSpec((None, H, 3 * H), lambda d, g: (d, 0, 0)),
                pl.BlockSpec((None, 1, H), lambda d, g: (d, 0, 0)),
            ],
            out_specs=[
                out_spec_main,
                pl.BlockSpec((None, B, H), lambda d, g: (d, 0, 0)),   # final hidden per dir
            ],
            scratch_shapes=[pltpu.VMEM((2, B, H), jnp.float32)],       # carried hidden per dir
        ),
        compiler_params=pltpu.CompilerParams(
            # Safe to shard the direction axis: all per-direction state is private to its slot.
            dimension_semantics=("parallel", "arbitrary"),
            vmem_limit_bytes=int(vmem_budget_bytes),
        ),
    )(gates_in, whh, bhh_n)

    if direct:
        outputs = out[:T] if padded else out                      # (T, B, 2H)
    else:
        outputs = jnp.concatenate([out[0, :T], out[1, :T]], axis=-1)

    # tiny final fc + tanh left to XLA (no separate pallas_call; no HBM round-trip of outputs)
    hidden = jnp.tanh(
        jnp.einsum("dbh,dhk->bk", h_final, params["wfc"].reshape(2, H, D))
        + params["bfc"])
    return outputs, hidden


# --------------------------- pure-JAX reference --------------------------------

def _gru_cell_ref(x, h, wih, whh, bih, bhh, hdim):
    gi = x @ wih + bih
    gh = h @ whh + bhh
    r = jax.nn.sigmoid(gi[:, :hdim] + gh[:, :hdim])
    z = jax.nn.sigmoid(gi[:, hdim:2 * hdim] + gh[:, hdim:2 * hdim])
    n = jnp.tanh(gi[:, 2 * hdim:] + r * gh[:, 2 * hdim:])
    return (1.0 - z) * n + z * h


def encoder_reference(tokens, params):
    emb = jnp.take(params["embedding"], tokens, axis=0)
    T, B, _ = emb.shape
    H = params["whh"].shape[1]
    h0 = jnp.zeros((B, H), jnp.float32)

    def make_step(d):
        def step(h, x):
            h2 = _gru_cell_ref(x, h, params["wih"][d], params["whh"][d],
                               params["bih"][d], params["bhh"][d], H)
            return h2, h2
        return step

    hf_final, out_f = lax.scan(make_step(0), h0, emb)
    hb_final, out_b_rev = lax.scan(make_step(1), h0, emb[::-1])
    out_b = out_b_rev[::-1]
    outputs = jnp.concatenate([out_f, out_b], axis=-1)
    hidden = jnp.tanh(jnp.concatenate([hf_final, hb_final], axis=-1) @ params["wfc"]
                      + params["bfc"])
    return outputs, hidden


# --------------------------------- params / main -------------------------------

def init_params(key, i_dim, e_dim, enc_h_dim, dec_h_dim):
    # Packed layout (per direction d in {0: fwd, 1: bwd}):
    #   wih[d] = weight_ih.T, columns ordered [r | z | n]   -> (E, 3H)
    #   whh[d] = weight_hh.T, columns ordered [r | z | n]   -> (H, 3H)
    #   bih[d], bhh[d] = (3H,) ; wfc = fc.weight.T (2H, D) ; bfc = (1, D)
    ks = jax.random.split(key, 8)
    kh = 1.0 / jnp.sqrt(enc_h_dim)
    kf = 1.0 / jnp.sqrt(2.0 * enc_h_dim)
    u = lambda k, shape, lim: jax.random.uniform(k, shape, jnp.float32, -lim, lim)
    return {
        "embedding": jax.random.normal(ks[0], (i_dim, e_dim), jnp.float32),
        "wih": u(ks[1], (2, e_dim, 3 * enc_h_dim), kh),
        "whh": u(ks[2], (2, enc_h_dim, 3 * enc_h_dim), kh),
        "bih": u(ks[3], (2, 3 * enc_h_dim), kh),
        "bhh": u(ks[4], (2, 3 * enc_h_dim), kh),
        "wfc": u(ks[5], (2 * enc_h_dim, dec_h_dim), kf),
        "bfc": u(ks[6], (1, dec_h_dim), kf),
    }


if __name__ == "__main__":
    # H a multiple of 128 -> lane-aligned gate slices and direct (T, B, 2H) output writes.
    i_dim, e_dim, enc_h_dim, dec_h_dim = 16, 32, 128, 64
    T, B = 8, 8

    key = jax.random.PRNGKey(0)
    pkey, tkey = jax.random.split(key)
    params = init_params(pkey, i_dim, e_dim, enc_h_dim, dec_h_dim)
    tokens = jax.random.randint(tkey, (T, B), 0, i_dim, dtype=jnp.int32)

    ref_out, ref_hid = encoder_reference(tokens, params)

    # 1) exactness check: f32 recurrence, multi-block time grid, no padding
    out32, hid32 = encoder_forward(tokens, params,
                                   recurrent_dtype=jnp.float32, max_time_block=4)
    out32, hid32 = jax.block_until_ready((out32, hid32))
    assert out32.shape == (T, B, 2 * enc_h_dim) and hid32.shape == (B, dec_h_dim)
    assert jnp.allclose(out32, ref_out, atol=5e-4, rtol=5e-4)
    assert jnp.allclose(hid32, ref_hid, atol=5e-4, rtol=5e-4)

    # 2) awkward sequence length -> padding path (T=7, tt=4 -> T_pad=8)
    tokens7 = tokens[:7]
    ref_out7, ref_hid7 = encoder_reference(tokens7, params)
    out7, hid7 = encoder_forward(tokens7, params,
                                 recurrent_dtype=jnp.float32, max_time_block=4)
    out7, hid7 = jax.block_until_ready((out7, hid7))
    assert out7.shape == (7, B, 2 * enc_h_dim)
    assert jnp.allclose(out7, ref_out7, atol=5e-4, rtol=5e-4)
    assert jnp.allclose(hid7, ref_hid7, atol=5e-4, rtol=5e-4)

    # 3) default performance config: bf16 gate stream + bf16 recurrent matmul on the MXU
    #    (bf16 rounding compounds over the recurrence -> looser tolerance; use
    #     recurrent_dtype=jnp.float32 when accuracy matters more than speed)
    outbf, hidbf = encoder_forward(tokens, params, recurrent_dtype=jnp.bfloat16)
    outbf, hidbf = jax.block_until_ready((outbf, hidbf))
    assert outbf.shape == (T, B, 2 * enc_h_dim) and hidbf.shape == (B, dec_h_dim)
    assert jnp.allclose(outbf, ref_out, atol=1e-1, rtol=1e-1)
    assert jnp.allclose(hidbf, ref_hid, atol=1e-1, rtol=1e-1)

    print("KERNEL_OK")
</pallas_src>

<mosaic_0001>
module attributes {stable_mosaic.version = 11 : i64} {
  func.func @_bigru_kernel(%arg0: i32, %arg1: i32, %arg2: memref<1x4x8x384xf32, #tpu.memory_space<vmem>>, %arg3: memref<1x128x384xf32, #tpu.memory_space<vmem>>, %arg4: memref<1x1x128xf32, #tpu.memory_space<vmem>>, %arg5: memref<4x8x128xf32, #tpu.memory_space<vmem>>, %arg6: memref<1x8x128xf32, #tpu.memory_space<vmem>>, %arg7: memref<2x8x128xf32, #tpu.memory_space<vmem>>) attributes {dimension_semantics = [#tpu.dimension_semantics<parallel>, #tpu.dimension_semantics<arbitrary>], iteration_bounds = array<i64: 2, 2>, scalar_prefetch = 0 : i64, scratch_operands = 1 : i64, tpu.core_type = #tpu.core_type<tc>, window_params = [{transform_indices = @transform_0, window_bounds = array<i64: 1, 4, 8, 384>}, {transform_indices = @transform_1, window_bounds = array<i64: 1, 128, 384>}, {transform_indices = @transform_2, window_bounds = array<i64: 1, 1, 128>}, {transform_indices = @transform_3, window_bounds = array<i64: 4, 8, 128>}, {transform_indices = @transform_4, window_bounds = array<i64: 1, 8, 128>}]} {
    %c0_i32 = arith.constant 0 : i32
    %0 = arith.cmpi eq, %arg1, %c0_i32 : i32
    %1 = arith.extui %0 : i1 to i32
    %c0_i32_0 = arith.constant 0 : i32
    %2 = arith.cmpi ne, %1, %c0_i32_0 : i32
    scf.if %2 {
      %cst_57 = arith.constant 0.000000e+00 : f32
      %177 = vector.broadcast %cst_57 : f32 to vector<8x128xf32>
      %178 = arith.index_cast %arg0 : i32 to index
      %c0_58 = arith.constant 0 : index
      %c0_59 = arith.constant 0 : index
      %179 = vector.load %arg7[%178, %c0_58, %c0_59] : memref<2x8x128xf32, #tpu.memory_space<vmem>>, vector<1x8x128xf32>
      %180 = vector.shape_cast %179 : vector<1x8x128xf32> to vector<8x128xf32>
      %181 = vector.shape_cast %177 : vector<8x128xf32> to vector<1x8x128xf32>
      tpu.vector_store %arg7[%178, %c0_58, %c0_59], %181 {strides = array<i32>} : memref<2x8x128xf32, #tpu.memory_space<vmem>>, vector<1x8x128xf32>,
    } else {
    }
    %c0 = arith.constant 0 : index
    %c0_1 = arith.constant 0 : index
    %c0_2 = arith.constant 0 : index
    %3 = vector.load %arg3[%c0, %c0_1, %c0_2] : memref<1x128x384xf32, #tpu.memory_space<vmem>>, vector<1x128x384xf32>
    %4 = vector.shape_cast %3 : vector<1x128x384xf32> to vector<128x384xf32>
    %c0_3 = arith.constant 0 : index
    %c0_4 = arith.constant 0 : index
    %c0_5 = arith.constant 0 : index
    %5 = vector.load %arg4[%c0_3, %c0_4, %c0_5] : memref<1x1x128xf32, #tpu.memory_space<vmem>>, vector<1x1x128xf32>
    %6 = vector.shape_cast %5 : vector<1x1x128xf32> to vector<1x128xf32>
    %7 = arith.index_cast %arg0 : i32 to index
    %c0_6 = arith.constant 0 : index
    %c0_7 = arith.constant 0 : index
    %8 = vector.load %arg7[%7, %c0_6, %c0_7] : memref<2x8x128xf32, #tpu.memory_space<vmem>>, vector<1x8x128xf32>
    %9 = vector.shape_cast %8 : vector<1x8x128xf32> to vector<8x128xf32>
    %c0_i32_8 = arith.constant 0 : i32
    %c2_i32 = arith.constant 2 : i32
    %10 = arith.muli %c2_i32, %c0_i32_8 : i32
    %c3_i32 = arith.constant 3 : i32
    %11 = arith.subi %c3_i32, %10 : i32
    %12 = arith.muli %arg0, %11 : i32
    %13 = arith.addi %c0_i32_8, %12 : i32
    %c0_9 = arith.constant 0 : index
    %14 = arith.index_cast %13 : i32 to index
    %c0_10 = arith.constant 0 : index
    %c0_11 = arith.constant 0 : index
    %15 = vector.load %arg2[%c0_9, %14, %c0_10, %c0_11] : memref<1x4x8x384xf32, #tpu.memory_space<vmem>>, vector<1x1x8x384xf32>
    %16 = vector.shape_cast %15 : vector<1x1x8x384xf32> to vector<8x384xf32>
    %cst = arith.constant dense<0.000000e+00> : vector<8x384xf32>
    %17 = tpu.matmul %9, %4, %cst {dimension_numbers = #tpu.dot_dimension_numbers<[1], [0], [0], [1], [0, 0, 1, 1], [], []>} : vector<8x128xf32>, vector<128x384xf32>, vector<8x384xf32> -> vector<8x384xf32>
    %18 = vector.extract_strided_slice %16 {offsets = [0, 0], sizes = [8, 128], strides = [1, 1]} : vector<8x384xf32> to vector<8x128xf32>
    %19 = vector.extract_strided_slice %17 {offsets = [0, 0], sizes = [8, 128], strides = [1, 1]} : vector<8x384xf32> to vector<8x128xf32>
    %20 = arith.addf %18, %19 : vector<8x128xf32>
    %21 = arith.negf %20 : vector<8x128xf32>
    %22 = math.exp %21 : vector<8x128xf32>
    %cst_12 = arith.constant 1.000000e+00 : f32
    %23 = vector.broadcast %cst_12 : f32 to vector<8x128xf32>
    %24 = arith.addf %23, %22 : vector<8x128xf32>
    %25 = arith.divf %23, %24 : vector<8x128xf32>
    %26 = vector.extract_strided_slice %16 {offsets = [0, 128], sizes = [8, 128], strides = [1, 1]} : vector<8x384xf32> to vector<8x128xf32>
    %27 = vector.extract_strided_slice %17 {offsets = [0, 128], sizes = [8, 128], strides = [1, 1]} : vector<8x384xf32> to vector<8x128xf32>
    %28 = arith.addf %26, %27 : vector<8x128xf32>
    %29 = arith.negf %28 : vector<8x128xf32>
    %30 = math.exp %29 : vector<8x128xf32>
    %cst_13 = arith.constant 1.000000e+00 : f32
    %31 = vector.broadcast %cst_13 : f32 to vector<8x128xf32>
    %32 = arith.addf %31, %30 : vector<8x128xf32>
    %33 = arith.divf %31, %32 : vector<8x128xf32>
    %34 = vector.extract_strided_slice %16 {offsets = [0, 256], sizes = [8, 128], strides = [1, 1]} : vector<8x384xf32> to vector<8x128xf32>
    %35 = vector.extract_strided_slice %17 {offsets = [0, 256], sizes = [8, 128], strides = [1, 1]} : vector<8x384xf32> to vector<8x128xf32>
    %36 = vector.broadcast %6 : vector<1x128xf32> to vector<8x128xf32>
    %37 = arith.addf %35, %36 : vector<8x128xf32>
    %38 = arith.mulf %25, %37 : vector<8x128xf32>
    %39 = arith.addf %34, %38 : vector<8x128xf32>
    %40 = math.tanh %39 : vector<8x128xf32>
    %cst_14 = arith.constant 1.000000e+00 : f32
    %41 = vector.broadcast %cst_14 : f32 to vector<8x128xf32>
    %42 = arith.subf %41, %33 : vector<8x128xf32>
    %43 = arith.mulf %42, %40 : vector<8x128xf32>
    %44 = arith.mulf %33, %9 : vector<8x128xf32>
    %45 = arith.addf %43, %44 : vector<8x128xf32>
    %46 = arith.index_cast %13 : i32 to index
    %c0_15 = arith.constant 0 : index
    %c0_16 = arith.constant 0 : index
    %47 = vector.load %arg5[%46, %c0_15, %c0_16] : memref<4x8x128xf32, #tpu.memory_space<vmem>>, vector<1x8x128xf32>
    %48 = vector.shape_cast %47 : vector<1x8x128xf32> to vector<8x128xf32>
    %49 = vector.shape_cast %45 : vector<8x128xf32> to vector<1x8x128xf32>
    tpu.vector_store %arg5[%46, %c0_15, %c0_16], %49 {strides = array<i32>} : memref<4x8x128xf32, #tpu.memory_space<vmem>>, vector<1x8x128xf32>,
    %c1_i32 = arith.constant 1 : i32
    %c2_i32_17 = arith.constant 2 : i32
    %50 = arith.muli %c2_i32_17, %c1_i32 : i32
    %c3_i32_18 = arith.constant 3 : i32
    %51 = arith.subi %c3_i32_18, %50 : i32
    %52 = arith.muli %arg0, %51 : i32
    %53 = arith.addi %c1_i32, %52 : i32
    %c0_19 = arith.constant 0 : index
    %54 = arith.index_cast %53 : i32 to index
    %c0_20 = arith.constant 0 : index
    %c0_21 = arith.constant 0 : index
    %55 = vector.load %arg2[%c0_19, %54, %c0_20, %c0_21] : memref<1x4x8x384xf32, #tpu.memory_space<vmem>>, vector<1x1x8x384xf32>
    %56 = vector.shape_cast %55 : vector<1x1x8x384xf32> to vector<8x384xf32>
    %cst_22 = arith.constant dense<0.000000e+00> : vector<8x384xf32>
    %57 = tpu.matmul %45, %4, %cst_22 {dimension_numbers = #tpu.dot_dimension_numbers<[1], [0], [0], [1], [0, 0, 1, 1], [], []>} : vector<8x128xf32>, vector<128x384xf32>, vector<8x384xf32> -> vector<8x384xf32>
    %58 = vector.extract_strided_slice %56 {offsets = [0, 0], sizes = [8, 128], strides = [1, 1]} : vector<8x384xf32> to vector<8x128xf32>
    %59 = vector.extract_strided_slice %57 {offsets = [0, 0], sizes = [8, 128], strides = [1, 1]} : vector<8x384xf32> to vector<8x128xf32>
    %60 = arith.addf %58, %59 : vector<8x128xf32>
    %61 = arith.negf %60 : vector<8x128xf32>
    %62 = math.exp %61 : vector<8x128xf32>
    %cst_23 = arith.constant 1.000000e+00 : f32
    %63 = vector.broadcast %cst_23 : f32 to vector<8x128xf32>
    %64 = arith.addf %63, %62 : vector<8x128xf32>
    %65 = arith.divf %63, %64 : vector<8x128xf32>
    %66 = vector.extract_strided_slice %56 {offsets = [0, 128], sizes = [8, 128], strides = [1, 1]} : vector<8x384xf32> to vector<8x128xf32>
    %67 = vector.extract_strided_slice %57 {offsets = [0, 128], sizes = [8, 128], strides = [1, 1]} : vector<8x384xf32> to vector<8x128xf32>
    %68 = arith.addf %66, %67 : vector<8x128xf32>
    %69 = arith.negf %68 : vector<8x128xf32>
    %70 = math.exp %69 : vector<8x128xf32>
    %cst_24 = arith.constant 1.000000e+00 : f32
    %71 = vector.broadcast %cst_24 : f32 to vector<8x128xf32>
    %72 = arith.addf %71, %70 : vector<8x128xf32>
    %73 = arith.divf %71, %72 : vector<8x128xf32>
    %74 = vector.extract_strided_slice %56 {offsets = [0, 256], sizes = [8, 128], strides = [1, 1]} : vector<8x384xf32> to vector<8x128xf32>
    %75 = vector.extract_strided_slice %57 {offsets = [0, 256], sizes = [8, 128], strides = [1, 1]} : vector<8x384xf32> to vector<8x128xf32>
    %76 = vector.broadcast %6 : vector<1x128xf32> to vector<8x128xf32>
    %77 = arith.addf %75, %76 : vector<8x128xf32>
    %78 = arith.mulf %65, %77 : vector<8x128xf32>
    %79 = arith.addf %74, %78 : vector<8x128xf32>
    %80 = math.tanh %79 : vector<8x128xf32>
    %cst_25 = arith.constant 1.000000e+00 : f32
    %81 = vector.broadcast %cst_25 : f32 to vector<8x128xf32>
    %82 = arith.subf %81, %73 : vector<8x128xf32>
    %83 = arith.mulf %82, %80 : vector<8x128xf32>
    %84 = arith.mulf %73, %45 : vector<8x128xf32>
    %85 = arith.addf %83, %84 : vector<8x128xf32>
    %86 = arith.index_cast %53 : i32 to index
    %c0_26 = arith.constant 0 : index
    %c0_27 = arith.constant 0 : index
    %87 = vector.load %arg5[%86, %c0_26, %c0_27] : memref<4x8x128xf32, #tpu.memory_space<vmem>>, vector<1x8x128xf32>
    %88 = vector.shape_cast %87 : vector<1x8x128xf32> to vector<8x128xf32>
    %89 = vector.shape_cast %85 : vector<8x128xf32> to vector<1x8x128xf32>
    tpu.vector_store %arg5[%86, %c0_26, %c0_27], %89 {strides = array<i32>} : memref<4x8x128xf32, #tpu.memory_space<vmem>>, vector<1x8x128xf32>,
    %c2_i32_28 = arith.constant 2 : i32
    %c2_i32_29 = arith.constant 2 : i32
    %90 = arith.muli %c2_i32_29, %c2_i32_28 : i32
    %c3_i32_30 = arith.constant 3 : i32
    %91 = arith.subi %c3_i32_30, %90 : i32
    %92 = arith.muli %arg0, %91 : i32
    %93 = arith.addi %c2_i32_28, %92 : i32
    %c0_31 = arith.constant 0 : index
    %94 = arith.index_cast %93 : i32 to index
    %c0_32 = arith.constant 0 : index
    %c0_33 = arith.constant 0 : index
    %95 = vector.load %arg2[%c0_31, %94, %c0_32, %c0_33] : memref<1x4x8x384xf32, #tpu.memory_space<vmem>>, vector<1x1x8x384xf32>
    %96 = vector.shape_cast %95 : vector<1x1x8x384xf32> to vector<8x384xf32>
    %cst_34 = arith.constant dense<0.000000e+00> : vector<8x384xf32>
    %97 = tpu.matmul %85, %4, %cst_34 {dimension_numbers = #tpu.dot_dimension_numbers<[1], [0], [0], [1], [0, 0, 1, 1], [], []>} : vector<8x128xf32>, vector<128x384xf32>, vector<8x384xf32> -> vector<8x384xf32>
    %98 = vector.extract_strided_slice %96 {offsets = [0, 0], sizes = [8, 128], strides = [1, 1]} : vector<8x384xf32> to vector<8x128xf32>
    %99 = vector.extract_strided_slice %97 {offsets = [0, 0], sizes = [8, 128], strides = [1, 1]} : vector<8x384xf32> to vector<8x128xf32>
    %100 = arith.addf %98, %99 : vector<8x128xf32>
    %101 = arith.negf %100 : vector<8x128xf32>
    %102 = math.exp %101 : vector<8x128xf32>
    %cst_35 = arith.constant 1.000000e+00 : f32
    %103 = vector.broadcast %cst_35 : f32 to vector<8x128xf32>
    %104 = arith.addf %103, %102 : vector<8x128xf32>
    %105 = arith.divf %103, %104 : vector<8x128xf32>
    %106 = vector.extract_strided_slice %96 {offsets = [0, 128], sizes = [8, 128], strides = [1, 1]} : vector<8x384xf32> to vector<8x128xf32>
    %107 = vector.extract_strided_slice %97 {offsets = [0, 128], sizes = [8, 128], strides = [1, 1]} : vector<8x384xf32> to vector<8x128xf32>
    %108 = arith.addf %106, %107 : vector<8x128xf32>
    %109 = arith.negf %108 : vector<8x128xf32>
    %110 = math.exp %109 : vector<8x128xf32>
    %cst_36 = arith.constant 1.000000e+00 : f32
    %111 = vector.broadcast %cst_36 : f32 to vector<8x128xf32>
    %112 = arith.addf %111, %110 : vector<8x128xf32>
    %113 = arith.divf %111, %112 : vector<8x128xf32>
    %114 = vector.extract_strided_slice %96 {offsets = [0, 256], sizes = [8, 128], strides = [1, 1]} : vector<8x384xf32> to vector<8x128xf32>
    %115 = vector.extract_strided_slice %97 {offsets = [0, 256], sizes = [8, 128], strides = [1, 1]} : vector<8x384xf32> to vector<8x128xf32>
    %116 = vector.broadcast %6 : vector<1x128xf32> to vector<8x128xf32>
    %117 = arith.addf %115, %116 : vector<8x128xf32>
    %118 = arith.mulf %105, %117 : vector<8x128xf32>
    %119 = arith.addf %114, %118 : vector<8x128xf32>
    %120 = math.tanh %119 : vector<8x128xf32>
    %cst_37 = arith.constant 1.000000e+00 : f32
    %121 = vector.broadcast %cst_37 : f32 to vector<8x128xf32>
    %122 = arith.subf %121, %113 : vector<8x128xf32>
    %123 = arith.mulf %122, %120 : vector<8x128xf32>
    %124 = arith.mulf %113, %85 : vector<8x128xf32>
    %125 = arith.addf %123, %124 : vector<8x128xf32>
    %126 = arith.index_cast %93 : i32 to index
    %c0_38 = arith.constant 0 : index
    %c0_39 = arith.constant 0 : index
    %127 = vector.load %arg5[%126, %c0_38, %c0_39] : memref<4x8x128xf32, #tpu.memory_space<vmem>>, vector<1x8x128xf32>
    %128 = vector.shape_cast %127 : vector<1x8x128xf32> to vector<8x128xf32>
    %129 = vector.shape_cast %125 : vector<8x128xf32> to vector<1x8x128xf32>
    tpu.vector_store %arg5[%126, %c0_38, %c0_39], %129 {strides = array<i32>} : memref<4x8x128xf32, #tpu.memory_space<vmem>>, vector<1x8x128xf32>,
    %c3_i32_40 = arith.constant 3 : i32
    %c2_i32_41 = arith.constant 2 : i32
    %130 = arith.muli %c2_i32_41, %c3_i32_40 : i32
    %c3_i32_42 = arith.constant 3 : i32
    %131 = arith.subi %c3_i32_42, %130 : i32
    %132 = arith.muli %arg0, %131 : i32
    %133 = arith.addi %c3_i32_40, %132 : i32
    %c0_43 = arith.constant 0 : index
    %134 = arith.index_cast %133 : i32 to index
    %c0_44 = arith.constant 0 : index
    %c0_45 = arith.constant 0 : index
    %135 = vector.load %arg2[%c0_43, %134, %c0_44, %c0_45] : memref<1x4x8x384xf32, #tpu.memory_space<vmem>>, vector<1x1x8x384xf32>
    %136 = vector.shape_cast %135 : vector<1x1x8x384xf32> to vector<8x384xf32>
    %cst_46 = arith.constant dense<0.000000e+00> : vector<8x384xf32>
    %137 = tpu.matmul %125, %4, %cst_46 {dimension_numbers = #tpu.dot_dimension_numbers<[1], [0], [0], [1], [0, 0, 1, 1], [], []>} : vector<8x128xf32>, vector<128x384xf32>, vector<8x384xf32> -> vector<8x384xf32>
    %138 = vector.extract_strided_slice %136 {offsets = [0, 0], sizes = [8, 128], strides = [1, 1]} : vector<8x384xf32> to vector<8x128xf32>
    %139 = vector.extract_strided_slice %137 {offsets = [0, 0], sizes = [8, 128], strides = [1, 1]} : vector<8x384xf32> to vector<8x128xf32>
    %140 = arith.addf %138, %139 : vector<8x128xf32>
    %141 = arith.negf %140 : vector<8x128xf32>
    %142 = math.exp %141 : vector<8x128xf32>
    %cst_47 = arith.constant 1.000000e+00 : f32
    %143 = vector.broadcast %cst_47 : f32 to vector<8x128xf32>
    %144 = arith.addf %143, %142 : vector<8x128xf32>
    %145 = arith.divf %143, %144 : vector<8x128xf32>
    %146 = vector.extract_strided_slice %136 {offsets = [0, 128], sizes = [8, 128], strides = [1, 1]} : vector<8x384xf32> to vector<8x128xf32>
    %147 = vector.extract_strided_slice %137 {offsets = [0, 128], sizes = [8, 128], strides = [1, 1]} : vector<8x384xf32> to vector<8x128xf32>
    %148 = arith.addf %146, %147 : vector<8x128xf32>
    %149 = arith.negf %148 : vector<8x128xf32>
    %150 = math.exp %149 : vector<8x128xf32>
    %cst_48 = arith.constant 1.000000e+00 : f32
    %151 = vector.broadcast %cst_48 : f32 to vector<8x128xf32>
    %152 = arith.addf %151, %150 : vector<8x128xf32>
    %153 = arith.divf %151, %152 : vector<8x128xf32>
    %154 = vector.extract_strided_slice %136 {offsets = [0, 256], sizes = [8, 128], strides = [1, 1]} : vector<8x384xf32> to vector<8x128xf32>
    %155 = vector.extract_strided_slice %137 {offsets = [0, 256], sizes = [8, 128], strides = [1, 1]} : vector<8x384xf32> to vector<8x128xf32>
    %156 = vector.broadcast %6 : vector<1x128xf32> to vector<8x128xf32>
    %157 = arith.addf %155, %156 : vector<8x128xf32>
    %158 = arith.mulf %145, %157 : vector<8x128xf32>
    %159 = arith.addf %154, %158 : vector<8x128xf32>
    %160 = math.tanh %159 : vector<8x128xf32>
    %cst_49 = arith.constant 1.000000e+00 : f32
    %161 = vector.broadcast %cst_49 : f32 to vector<8x128xf32>
    %162 = arith.subf %161, %153 : vector<8x128xf32>
    %163 = arith.mulf %162, %160 : vector<8x128xf32>
    %164 = arith.mulf %153, %125 : vector<8x128xf32>
    %165 = arith.addf %163, %164 : vector<8x128xf32>
    %166 = arith.index_cast %133 : i32 to index
    %c0_50 = arith.constant 0 : index
    %c0_51 = arith.constant 0 : index
    %167 = vector.load %arg5[%166, %c0_50, %c0_51] : memref<4x8x128xf32, #tpu.memory_space<vmem>>, vector<1x8x128xf32>
    %168 = vector.shape_cast %167 : vector<1x8x128xf32> to vector<8x128xf32>
    %169 = vector.shape_cast %165 : vector<8x128xf32> to vector<1x8x128xf32>
    tpu.vector_store %arg5[%166, %c0_50, %c0_51], %169 {strides = array<i32>} : memref<4x8x128xf32, #tpu.memory_space<vmem>>, vector<1x8x128xf32>,
    %c4_i32 = arith.constant 4 : i32
    %170 = arith.index_cast %arg0 : i32 to index
    %c0_52 = arith.constant 0 : index
    %c0_53 = arith.constant 0 : index
    %171 = vector.load %arg7[%170, %c0_52, %c0_53] : memref<2x8x128xf32, #tpu.memory_space<vmem>>, vector<1x8x128xf32>
    %172 = vector.shape_cast %171 : vector<1x8x128xf32> to vector<8x128xf32>
    %173 = vector.shape_cast %165 : vector<8x128xf32> to vector<1x8x128xf32>
    tpu.vector_store %arg7[%170, %c0_52, %c0_53], %173 {strides = array<i32>} : memref<2x8x128xf32, #tpu.memory_space<vmem>>, vector<1x8x128xf32>,
    %c0_54 = arith.constant 0 : index
    %c0_55 = arith.constant 0 : index
    %c0_56 = arith.constant 0 : index
    %174 = vector.load %arg6[%c0_54, %c0_55, %c0_56] : memref<1x8x128xf32, #tpu.memory_space<vmem>>, vector<1x8x128xf32>
    %175 = vector.shape_cast %174 : vector<1x8x128xf32> to vector<8x128xf32>
    %176 = vector.shape_cast %165 : vector<8x128xf32> to vector<1x8x128xf32>
    tpu.vector_store %arg6[%c0_54, %c0_55, %c0_56], %176 {strides = array<i32>} : memref<1x8x128xf32, #tpu.memory_space<vmem>>, vector<1x8x128xf32>,
    return
  }
  func.func @transform_0(%arg0: i32, %arg1: i32) -> (i32, i32, i32, i32) {
    %c2_i32 = arith.constant 2 : i32
    %0 = arith.muli %c2_i32, %arg1 : i32
    %c1_i32 = arith.constant 1 : i32
    %1 = arith.subi %c1_i32, %0 : i32
    %2 = arith.muli %arg0, %1 : i32
    %3 = arith.addi %arg1, %2 : i32
    %c0_i32 = arith.constant 0 : i32
    %c0_i32_0 = arith.constant 0 : i32
    %c0_i32_1 = arith.constant 0 : i32
    return %arg0, %3, %c0_i32, %c0_i32_0 : i32, i32, i32, i32
  }
  func.func @transform_1(%arg0: i32, %arg1: i32) -> (i32, i32, i32) {
    %c0_i32 = arith.constant 0 : i32
    %c0_i32_0 = arith.constant 0 : i32
    %c0_i32_1 = arith.constant 0 : i32
    return %arg0, %c0_i32, %c0_i32_0 : i32, i32, i32
  }
  func.func @transform_2(%arg0: i32, %arg1: i32) -> (i32, i32, i32) {
    %c0_i32 = arith.constant 0 : i32
    %c0_i32_0 = arith.constant 0 : i32
    %c0_i32_1 = arith.constant 0 : i32
    return %arg0, %c0_i32, %c0_i32_0 : i32, i32, i32
  }
  func.func @transform_3(%arg0: i32, %arg1: i32) -> (i32, i32, i32) {
    %c2_i32 = arith.constant 2 : i32
    %0 = arith.muli %c2_i32, %arg1 : i32
    %c1_i32 = arith.constant 1 : i32
    %1 = arith.subi %c1_i32, %0 : i32
    %2 = arith.muli %arg0, %1 : i32
    %3 = arith.addi %arg1, %2 : i32
    %c0_i32 = arith.constant 0 : i32
    %c0_i32_0 = arith.constant 0 : i32
    return %3, %c0_i32, %arg0 : i32, i32, i32
  }
  func.func @transform_4(%arg0: i32, %arg1: i32) -> (i32, i32, i32) {
    %c0_i32 = arith.constant 0 : i32
    %c0_i32_0 = arith.constant 0 : i32
    %c0_i32_1 = arith.constant 0 : i32
    return %arg0, %c0_i32, %c0_i32_0 : i32, i32, i32
  }
}

</mosaic_0001>

<bundles_post_ra>
// kernel: encoder_forward.1
= control target key start
LH: loop header
LB: loop body
LE: loop exit
PB: predicated region body
PF: predicated region fallthrough
CT: control target
= control target key end

     0   :  { %10 = vsyncpa [#allocation4], 0  ;;  %s2409_s0 = inlined_call_operand.vmem [shape: f32[2,8,8,384], index: 0, kind: input, shape index: {}]   ;;  %s2410_s1 = inlined_call_operand.vmem [shape: f32[2,128,384], index: 1, kind: input, shape index: {}]   ;;  %s2411_s2 = inlined_call_operand.vmem [shape: f32[2,1,128], index: 2, kind: input, shape index: {}]   ;;  %s2412_s3 = inlined_call_operand.hbm [shape: f32[8,8,256], index: 3, kind: output, shape index: {0}]   ;;  %s2413_s4 = inlined_call_operand.vmem [shape: f32[2,8,128], index: 4, kind: output, shape index: {1}]  }
   0x1   :  { %12 = vsyncpa [#allocation4 + $0x1], 0  ;;  %s1765_s15 = smov 0   ;;  %s1767_s16 = smov 0  }
   0x2   :  { %s1769_s17 = smov 0   ;;  %s1771_s18 = smov 0  }
   0x3   :  { %s1773_s19 = smov 0   ;;  %s1775_s20 = smov 0  }
   0x4   :  { %s1777_s21 = smov 0   ;;  %s1779_s22 = smov 0  }
   0x5 LB: > { %2427 = sst [smem:[#allocation6_spill]] %s1703_s15  ;;  %s1258_s23 = sadd.s32 4294967295, %s1731_s22   ;;  %s1731_s22 = sphi %s1779_s22, %s18_s22   ;;  %s1727_s21 = sphi %s1777_s21, %s2452_s21   ;;  %s1723_s20 = sphi %s1775_s20, %s2451_s20   ;;  %s1719_s19 = sphi %s1773_s19, %s2450_s19   ;;  %s1715_s18 = sphi %s1771_s18, %s2449_s18   ;;  %s1711_s17 = sphi %s1769_s17, %s2448_s17   ;;  %s1707_s16 = sphi %s1767_s16, %s2454_s16   ;;  %s1703_s15 = sphi %s1765_s15, %s2453_s15  }
   0x6   : > { %2428 = sst [smem:[#allocation7_spill]] %s1711_s17  ;;  %s1259_s24 = sadd.s32 4294967294, %s1731_s22  }
   0x7   : > { %2429 = sst [smem:[#allocation8_spill]] %s1723_s20  ;;  %s27_s25 = sadd.s32 1, %s1723_s20 }
   0x8   : > { %2430 = sst [smem:[#allocation9_spill]] %s1727_s21  ;;  %s30_s26 = sadd.s32 1, %s1727_s21 }
   0x9   : > { %p28_p0 = scmp.ge.s32.totalorder %s27_s25, 2  ;;  %s1262_s27 = sshll.u32 %s1723_s20, 1 }
   0xa   : > { %s123_s28 = ssub.s32 1, %s1262_s27  ;;  %s135_s29 = sadd.s32 1, %s1711_s17 }
   0xb   : > { %s2456_s25 = smov (%p28_p0, %s27_s25), 0  ;;  %s2458_s26 = smov (!%p28_p0, %s30_s26), %s1727_s21 }
   0xc   : > { %2431 = sst [smem:[#allocation10_spill]] %s2456_s25  ;;  %s124_s30 = smul.u32 %s1727_s21, %s123_s28 }
   0xd   : > { %s1263_s5 = sshll.u32 %s2456_s25, 1  ;;  %p32_p1 = scmp.ge.s32.totalorder %s2458_s26, 2 }
   0xe   : > { %s127_s6 = ssub.s32 1, %s1263_s5  ;;  %s125_s7 = sadd.s32 %s1723_s20, %s124_s30 }
   0xf   : > { %p145_p2 = scmp.ne.s32.totalorder %s1711_s17, %s1707_s16  ;;  %s2460_s26 = smov (%p32_p1, %s2458_s26), 0 }
  0x10   : > { %2432 = sst [smem:[#allocation11_spill]] %s2460_s26  ;;  %p146_p3 = scmp.eq.s32.totalorder %s1258_s23, 3 }
  0x11   : > { %p151_p4 = scmp.ne.s32.totalorder %s1707_s16, %s1703_s15  ;;  %s128_s8 = smul.u32 %s127_s6, %s2460_s26 }
  0x12   : > { %s131_s9 = ssub.s32 %s1727_s21, %s2460_s26  ;;  %p1826_p5 = por %p146_p3, %p145_p2 }
  0x13   : > { %p152_p6 = scmp.eq.s32.totalorder %s1259_s24, 3  ;;  %s129_s11 = sadd.s32 %s128_s8, %s2456_s25 }
  0x14   : > { %p1266_p7 = scmp.ge.s32.totalorder %s1731_s22, 1  ;;  %s130_s12 = ssub.s32 %s125_s7, %s129_s11 }
  0x15   : > { %p1832_p8 = por %p152_p6, %p151_p4  ;;  %s132_s14 = sor.u32 %s131_s9, %s130_s12 }
  0x16   : > { %p232_p9 = scmp.lt.s32.totalorder %s1731_s22, 5  ;;  %p133_p10 = scmp.eq.s32.totalorder %s132_s14, 0 }
  0x17   : > { %s2434_s13 = scalar_select %p1832_p8, 1, 0 }
  0x18   : > { %p233_p11 = pnand %p1266_p7, %p232_p9 }
  0x19   : > { %2435 = sst [smem:[#allocation12_spill]] %s2434_s13 }
  0x1a   : > { %s1838_s23 = scalar_select %p133_p10, %s1711_s17, %s135_s29  }
  0x1b   : > { %236 = sbr.rel (%p233_p11) target bundleno = 1096 (0x448), region = 32 }
  0x1c   : > { %2436 = sst [smem:[#allocation13_spill]] %s1838_s23 }
  0x20   : > { %s2414_s24 = sand.u32 1, %s1707_s16   ;;  %s1268_s27 = sshll.u32 %s1715_s18, 1 }
  0x21   : > { %s1267_s28 = sshll.u32 %s2414_s24, 5  ;;  %s280_s30 = ssub.s32 1, %s1268_s27 }
  0x22   : > { %s281_s5 = smul.u32 %s1719_s19, %s280_s30  ;;  %p284_p12 = scmp.lt.s32.totalorder %s1719_s19, 1 }
  0x23   : > { %s1875_s11 = scalar_lea.vmem [#allocation3], %s1267_s28  ;;  %p1273_p0 = scmp.ne.s32.totalorder %s1715_s18, 0 }
  0x24   : > { %s1847_s6 = sadd.s32 %s1715_s18, %s281_s5  ;;  %s1274_s24 = sshll.u32 (!%p1273_p0), %s1719_s19, 3 }
  0x25   : > { %s1269_s29 = sshll.u32 %s1847_s6, 2 }
  0x26   : > { %s1851_s7 = scalar_select %p284_p12, %s1719_s19, 1 }
  0x27   : > { %p286_p13 = scmp.lt.s32.totalorder %s1269_s29, 7 }
  0x28   : > { %s1520_s8 = smul.u32 24, %s1851_s7  ;;  %s305_s12 = scalar_lea.vmem %s2411_s2, %s1851_s7 }
  0x29   : > { %s2462_s29 = smov (!%p286_p13, %s1269_s29), 7  ;;  %s1521_s14 = smul.u32 384, %s1851_s7 }
  0x2a   : > { %s1272_s27 = sshll.u32 %s1851_s7, 3  ;;  %s1519_s30 = smul.u32 3, %s2462_s29 }
  0x2b   : > { %s1863_s26 = scalar_lea.vmem %s2413_s4, %s1272_s27  ;;  %s1868_s20 = scalar_lea.vmem %s2410_s1, %s1521_s14 }
  0x2c   : > { %s290_s23 = sadd.s32 %s1520_s8, %s1519_s30  ;;  %318 = sbr.rel (%p1273_p0) target bundleno = 51 (0x33), region = 36 }
  0x2d   : > { %s1270_s17 = sshll.u32 %s290_s23, 3  ;;  %s320_s29 = scalar_lea.vmem (!%p1273_p0), [#allocation2], %s1274_s24 }
  0x2e   : > { %s1873_s9 = scalar_lea.vmem %s2409_s0, %s1270_s17 }
  0x31   : > { %v1733_v0 = vmov 0.0  }
  0x32   : > { %321 = vst [vmem:[%s320_s29] sm:$0xff] %v1733_v0 }
  0x33 PF: > { %v1880_v1 = vld [vmem:[%s1868_s20 + $0x170] sm:$0xff]  ;;  %v1883_v2 = vld [vmem:[%s1868_s20 + $0x168] sm:$0xff]  ;;  %v1886_v3 = vld [vmem:[%s1868_s20 + $0x158] sm:$0xff]  ;;  %v2422_v5 = vmov 0.0   ;;  %vm1735_vm0 = vmmov 0   ;;  %s1275_s15 = sshll.u32 %s1719_s19, 3 }
  0x34   : > { %381 = vmatprep.subr.mxu0 %v1880_v1  ;;  %v1890_v4 = vld [vmem:[%s1868_s20 + $0x150] sm:$0xff]  ;;  %1379 = vmatprep.subr.mxu1 %v2422_v5  ;;  %v1895_v6 = vld [vmem:[%s1868_s20 + $0x140] sm:$0xff]  ;;  %v1900_v7 = vld [vmem:[%s1868_s20 + $0x138] sm:$0xff]  ;;  %s2064_s17 = scalar_lea.vmem [#allocation2], %s1275_s15  ;;  %s1308_s18 = smul.u32 72, %s1719_s19 }
  0x35   : > { %382 = vmatpush1.msra.mxu0 %v1883_v2  ;;  %445 = vmatprep.mubr.f32.mxu0 %v2422_v5  ;;  %v1906_v8 = vld [vmem:[%s1868_s20 + $0x128] sm:$0xff]  ;;  %v1910_v9 = vld [vmem:[%s1868_s20 + $0x120] sm:$0xff]  ;;  %v1914_v10 = vld [vmem:[%s1868_s20 + $0x110] sm:$0xff]  ;;  %s1281_s13 = smul.u32 24, %s1719_s19  ;;  %s1176_s7 = scalar_lea.vmem %s1875_s11, %s1275_s15 [#allocation3] }
  0x36   : > { %383 = vmatprep.subr.mxu0 %v1886_v3  ;;  %1411 = vmatprep.mubr.msk.f32.mxu1 %vm1735_vm0, %v2422_v5  ;;  %v1918_v11 = vld [vmem:[%s1868_s20 + $0x108] sm:$0xff]  ;;  %v1922_v12 = vld [vmem:[%s1868_s20 + $0xf8] sm:$0xff]  ;;  %v1926_v13 = vld [vmem:[%s1868_s20 + $0xf0] sm:$0xff]  ;;  %s726_s8 = ssub.s32 2, %s1719_s19  ;;  %s1293_s5 = smul.u32 4294967224, %s1719_s19 }
  0x37   : > { %384 = vmatpush1.msra.mxu0 %v1890_v4  ;;  %v1930_v14 = vld [vmem:[%s1868_s20 + $0xe0] sm:$0xff]  ;;  %v1933_v15 = vld [vmem:[%s1868_s20 + $0x178] sm:$0xff]  ;;  %v1945_v18 = vld [vmem:[%s1868_s20 + $0xc8] sm:$0xff]  ;;  %s551_s23 = scalar_lea.vmem %s1875_s11, %s1281_s13 [#allocation3]  ;;  %s1173_s28 = scalar_lea.vmem %s1873_s9, %s1281_s13 }
  0x38   : > { %385 = vmatprep.subr.mxu0 %v1895_v6  ;;  %v1937_v16 = vld [vmem:[%s1868_s20 + $0xd8] sm:$0xff]  ;;  %1380 = vmatpush3.msra.mxu1 %v1933_v15  ;;  %v1941_v17 = vld [vmem:[%s1868_s20 + $0x160] sm:$0xff]  ;;  %v1949_v19 = vld [vmem:[%s1868_s20 + $0x148] sm:$0xff]  ;;  %s1292_s27 = sshll.u32 %s726_s8, 3  ;;  %s1184_s24 = scalar_lea.vmem %s1873_s9, %s1293_s5 }
  0x39   : > { %386 = vmatpush1.msra.mxu0 %v1900_v7  ;;  %1381 = vmatprep.subr.mxu1 %v2422_v5  ;;  %v1953_v20 = vld [vmem:[%s1868_s20 + $0xc0] sm:$0xff]  ;;  %v1958_v21 = vld [vmem:[%s1868_s20 + $0xb0] sm:$0xff]  ;;  %v1966_v23 = vld [vmem:[%s1868_s20 + $0xa8] sm:$0xff]  ;;  %s897_s30 = scalar_lea.vmem %s1875_s11, %s1292_s27 [#allocation3]  ;;  %s1299_s15 = smul.u32 4294967272, %s1719_s19 }
  0x3a   : > { %387 = vmatprep.subr.mxu0 %v1906_v8  ;;  %1382 = vmatpush3.msra.mxu1 %v1941_v17  ;;  %v1962_v22 = vld [vmem:[%s1868_s20 + $0x130] sm:$0xff]  ;;  %v1971_v24 = vld [vmem:[%s1868_s20 + $0x98] sm:$0xff]  ;;  %v1984_v27 = vld [vmem:[%s1868_s20 + $0x80] sm:$0xff] }
  0x3b   : > { %388 = vmatpush1.msra.mxu0 %v1910_v9  ;;  %1383 = vmatprep.subr.mxu1 %v2422_v5  ;;  %v1975_v25 = vld [vmem:[%s1868_s20 + $0x118] sm:$0xff]  ;;  %v1979_v26 = vld [vmem:[%s1868_s20 + $0x90] sm:$0xff]  ;;  %v1988_v28 = vld [vmem:[%s1868_s20 + $0x100] sm:$0xff]  ;;  %s1188_s21 = scalar_lea.vmem %s1875_s11, %s1299_s15 [#allocation3] }
  0x3c   : > { %389 = vmatprep.subr.mxu0 %v1914_v10  ;;  %1384 = vmatpush3.msra.mxu1 %v1949_v19  ;;  %v1992_v29 = vld [vmem:[%s1868_s20 + $0x78] sm:$0xff]  ;;  %v1997_v30 = vld [vmem:[%s1868_s20 + $0x68] sm:$0xff]  ;;  %v2005_v32 = vld [vmem:[%s1868_s20 + $0x60] sm:$0xff] }
  0x3d   : > { %390 = vmatpush1.msra.mxu0 %v1918_v11  ;;  %1385 = vmatprep.subr.mxu1 %v2422_v5  ;;  %v2001_v31 = vld [vmem:[%s1868_s20 + $0xe8] sm:$0xff]  ;;  %v2010_v33 = vld [vmem:[%s1868_s20 + $0x50] sm:$0xff]  ;;  %v2023_v36 = vld [vmem:[%s1868_s20 + $0x38] sm:$0xff] }
  0x3e   : > { %391 = vmatprep.subr.mxu0 %v1922_v12  ;;  %1386 = vmatpush3.msra.mxu1 %v1962_v22  ;;  %v2014_v34 = vld [vmem:[%s1868_s20 + $0xd0] sm:$0xff]  ;;  %v2018_v35 = vld [vmem:[%s1868_s20 + $0x48] sm:$0xff]  ;;  %v2028_v37 = vld [vmem:[%s1868_s20 + $0xb8] sm:$0xff] }
  0x3f   : > { %392 = vmatpush1.msra.mxu0 %v1926_v13  ;;  %1387 = vmatprep.subr.mxu1 %v2422_v5  ;;  %v2032_v38 = vld [vmem:[%s1868_s20 + $0x30] sm:$0xff]  ;;  %v2037_v39 = vld [vmem:[%s1868_s20 + $0x20] sm:$0xff]  ;;  %v2045_v41 = vld [vmem:[%s1868_s20 + $0x18] sm:$0xff] }
  0x40   : > { %393 = vmatprep.subr.mxu0 %v1930_v14  ;;  %1388 = vmatpush3.msra.mxu1 %v1975_v25  ;;  %v2041_v40 = vld [vmem:[%s1868_s20 + $0xa0] sm:$0xff]  ;;  %v2050_v42 = vld [vmem:[%s1868_s20 + $0x8] sm:$0xff]  ;;  %v2071_v46 = vld [vmem:[%s1868_s20 + $0x70] sm:$0xff] }
  0x41   : > { %394 = vmatpush1.msra.mxu0 %v1937_v16  ;;  %1389 = vmatprep.subr.mxu1 %v2422_v5  ;;  %2437 = vst [vmem:[#allocation14_spill] sm:$0xff] %v2050_v42  ;;  %v2054_v43 = vld [vmem:[%s1868_s20 + $0x88] sm:$0xff]  ;;  %v2058_v44 = vld [vmem:[%s1868_s20] sm:$0xff]  ;;  %v2078_v47 = vld [vmem:[%s1868_s20 + $0x58] sm:$0xff] }
  0x42   : > { %395 = vmatprep.subr.mxu0 %v1945_v18  ;;  %1390 = vmatpush3.msra.mxu1 %v1988_v28  ;;  %2438 = vst [vmem:[#allocation15_spill] sm:$0xff] %v2058_v44  ;;  %v2067_v45 = vld [vmem:[%s2064_s17] sm:$0xff]  ;;  %v2091_v49 = vld [vmem:[%s1868_s20 + $0x28] sm:$0xff]  ;;  %v2098_v50 = vld [vmem:[%s1868_s20 + $0x10] sm:$0xff] }
  0x43   : > { %396 = vmatpush1.msra.mxu0 %v1953_v20  ;;  %1391 = vmatprep.subr.mxu1 %v2422_v5  ;;  %v2084_v48 = vld [vmem:[%s1868_s20 + $0x40] sm:$0xff]  ;;  %2439 = vst [vmem:[#allocation16_spill] sm:$0xff] %v2098_v50  ;;  %s377_s20 = scalar_lea.vmem %s1873_s9, %s1308_s18 }
  0x44   : > { %397 = vmatprep.subr.mxu0 %v1958_v21  ;;  %1392 = vmatpush3.msra.mxu1 %v2001_v31  ;;  %v378_v51 = vld [vmem:[%s377_s20] sm:$0xff]  ;;  %v379_v55 = vld [vmem:[%s377_s20 + $0x8] sm:$0xff] }
  0x45   : > { %398 = vmatpush1.msra.mxu0 %v1966_v23  ;;  %1393 = vmatprep.subr.mxu1 %v2422_v5  ;;  %v2176_v0 = vld [vmem:[%s305_s12] ss:$0 sm:$0xff]  ;;  %s1309_s12 = smul.u32 24, %s726_s8 }
  0x46   : > { %399 = vmatprep.subr.mxu0 %v1971_v24  ;;  %1394 = vmatpush3.msra.mxu1 %v2014_v34 }
  0x47   : > { %400 = vmatpush1.msra.mxu0 %v1979_v26  ;;  %1395 = vmatprep.subr.mxu1 %v2422_v5  ;;  %s729_s14 = scalar_lea.vmem %s1873_s9, %s1309_s12  ;;  %s1310_s9 = sshll.u32 %s1847_s6, 3 }
  0x48   : > { %401 = vmatprep.subr.mxu0 %v1984_v27  ;;  %1396 = vmatpush3.msra.mxu1 %v2028_v37  ;;  %s1096_s29 = sadd.s32 %s1719_s19, %s1310_s9  ;;  %s2444_s19 = sand.u32 1, %s1707_s16  }
  0x49   : > { %402 = vmatpush1.msra.mxu0 %v1992_v29  ;;  %1397 = vmatprep.subr.mxu1 %v2422_v5  ;;  %s1305_s18 = sshll.u32 %s1096_s29, 7  ;;  %s2358_s6 = scalar_lea.sflag [#allocation4], %s2444_s19 }
  0x4a   : > { %403 = vmatprep.subr.mxu0 %v1997_v30  ;;  %1398 = vmatpush3.msra.mxu1 %v2041_v40 }
  0x4b   : > { %404 = vmatpush1.msra.mxu0 %v2005_v32  ;;  %1399 = vmatprep.subr.mxu1 %v2422_v5 }
  0x4c   : > { %405 = vmatprep.subr.mxu0 %v2010_v33  ;;  %1400 = vmatpush3.msra.mxu1 %v2054_v43 }
  0x4d   : > { %406 = vmatpush1.msra.mxu0 %v2018_v35  ;;  %1401 = vmatprep.subr.mxu1 %v2422_v5 }
  0x4e   : > { %407 = vmatprep.subr.mxu0 %v2023_v36  ;;  %1402 = vmatpush3.msra.mxu1 %v2071_v46 }
  0x4f   : > { %408 = vmatpush1.msra.mxu0 %v2032_v38  ;;  %1403 = vmatprep.subr.mxu1 %v2422_v5 }
  0x50   : > { %409 = vmatprep.subr.mxu0 %v2037_v39  ;;  %1404 = vmatpush3.msra.mxu1 %v2078_v47 }
  0x51   : > { %410 = vmatpush1.msra.mxu0 %v2045_v41  ;;  %1405 = vmatprep.subr.mxu1 %v2422_v5 }
  0x52   : > { %411 = vmatprep.subr.mxu0 %v2050_v42  ;;  %1406 = vmatpush3.msra.mxu1 %v2084_v48 }
  0x53   : > { %412 = vmatpush1.msra.mxu0 %v2058_v44  ;;  %1407 = vmatprep.subr.mxu1 %v2422_v5 }
  0x54   : > { %446 = vmatmul.mubr.f32.vlgmr.msra.gmra.mxu0 %v2067_v45  ;;  %560 = vmatprep.subr.mxu0 %v1880_v1 }
  0x55   : > { %561 = vmatpush1.msra.mxu0 %v1883_v2  ;;  %1408 = vmatpush3.msra.mxu1 %v2091_v49 }
  0x56   : > { %562 = vmatprep.subr.mxu0 %v1886_v3  ;;  %1409 = vmatprep.subr.mxu1 %v2422_v5 }
  0x57   : > { %563 = vmatpush1.msra.mxu0 %v1890_v4  ;;  %1410 = vmatpush3.msra.mxu1 %v2098_v50 }
  0x58   : > { %564 = vmatprep.subr.mxu0 %v1895_v6  ;;  %1412 = vmatmul.mubr.f32.vlgmr.msra.gmra.mxu1 %v2067_v45 }
  0x59   : > { %565 = vmatpush1.msra.mxu0 %v1900_v7  ;;  %1414 = vmatprep.subr.mxu1 %v2422_v5 }
  0x5a   : > { %566 = vmatprep.subr.mxu0 %v1906_v8  ;;  %1415 = vmatpush3.msra.mxu1 %v1933_v15 }
  0x5b   : > { %567 = vmatpush1.msra.mxu0 %v1910_v9  ;;  %1416 = vmatprep.subr.mxu1 %v2422_v5 }
  0x5c   : > { %568 = vmatprep.subr.mxu0 %v1914_v10  ;;  %1417 = vmatpush3.msra.mxu1 %v1941_v17 }
  0x5d   : > { %569 = vmatpush1.msra.mxu0 %v1918_v11  ;;  %1418 = vmatprep.subr.mxu1 %v2422_v5 }
  0x5e   : > { %570 = vmatprep.subr.mxu0 %v1922_v12  ;;  %1419 = vmatpush3.msra.mxu1 %v1949_v19 }
  0x5f   : > { %571 = vmatpush1.msra.mxu0 %v1926_v13  ;;  %1420 = vmatprep.subr.mxu1 %v2422_v5 }
  0x60   : > { %572 = vmatprep.subr.mxu0 %v1930_v14  ;;  %1421 = vmatpush3.msra.mxu1 %v1962_v22 }
  0x61   : > { %573 = vmatpush1.msra.mxu0 %v1937_v16  ;;  %1422 = vmatprep.subr.mxu1 %v2422_v5 }
  0x62   : > { %574 = vmatprep.subr.mxu0 %v1945_v18  ;;  %1423 = vmatpush3.msra.mxu1 %v1975_v25 }
  0x63   : > { %575 = vmatpush1.msra.mxu0 %v1953_v20  ;;  %1424 = vmatprep.subr.mxu1 %v2422_v5 }
  0x64   : > { %576 = vmatprep.subr.mxu0 %v1958_v21  ;;  %1425 = vmatpush3.msra.mxu1 %v1988_v28 }
  0x65   : > { %577 = vmatpush1.msra.mxu0 %v1966_v23  ;;  %1426 = vmatprep.subr.mxu1 %v2422_v5 }
  0x66   : > { %578 = vmatprep.subr.mxu0 %v1971_v24  ;;  %1427 = vmatpush3.msra.mxu1 %v2001_v31 }
  0x67   : > { %579 = vmatpush1.msra.mxu0 %v1979_v26  ;;  %1428 = vmatprep.subr.mxu1 %v2422_v5 }
  0x68   : > { %580 = vmatprep.subr.mxu0 %v1984_v27  ;;  %1429 = vmatpush3.msra.mxu1 %v2014_v34 }
  0x69   : > { %581 = vmatpush1.msra.mxu0 %v1992_v29  ;;  %1430 = vmatprep.subr.mxu1 %v2422_v5 }
  0x6a   : > { %582 = vmatprep.subr.mxu0 %v1997_v30  ;;  %1431 = vmatpush3.msra.mxu1 %v2028_v37 }
  0x6b   : > { %583 = vmatpush1.msra.mxu0 %v2005_v32  ;;  %1432 = vmatprep.subr.mxu1 %v2422_v5 }
  0x6c   : > { %584 = vmatprep.subr.mxu0 %v2010_v33  ;;  %1433 = vmatpush3.msra.mxu1 %v2041_v40 }
  0x6d   : > { %585 = vmatpush1.msra.mxu0 %v2018_v35  ;;  %1434 = vmatprep.subr.mxu1 %v2422_v5 }
  0x6e   : > { %586 = vmatprep.subr.mxu0 %v2023_v36  ;;  %1435 = vmatpush3.msra.mxu1 %v2054_v43 }
  0x6f   : > { %587 = vmatpush1.msra.mxu0 %v2032_v38  ;;  %1436 = vmatprep.subr.mxu1 %v2422_v5 }
  0x70   : > { %588 = vmatprep.subr.mxu0 %v2037_v39  ;;  %1437 = vmatpush3.msra.mxu1 %v2071_v46 }
  0x71   : > { %589 = vmatpush1.msra.mxu0 %v2045_v41  ;;  %1438 = vmatprep.subr.mxu1 %v2422_v5 }
  0x72   : > { %590 = vmatprep.subr.mxu0 %v2050_v42  ;;  %1439 = vmatpush3.msra.mxu1 %v2078_v47 }
  0x73   : > { %591 = vmatpush1.msra.mxu0 %v2058_v44  ;;  %624 = vmatprep.mubr.f32.mxu0 %v2422_v5 }
  0x74   : > { %1440 = vmatprep.subr.mxu1 %v2422_v5  ;;  %1446 = vmatprep.mubr.msk.f32.mxu1 %vm1735_vm0, %v2422_v5 }
  0x75   : > { %1441 = vmatpush3.msra.mxu1 %v2084_v48  ;;  %733 = vmatprep.subr.mxu0 %v1880_v1 }
  0x76   : > { %1442 = vmatprep.subr.mxu1 %v2422_v5 }
  0x77   : > { %1443 = vmatpush3.msra.mxu1 %v2091_v49 }
  0x78   : > { %1444 = vmatprep.subr.mxu1 %v2422_v5 }
  0x79   : > { %1445 = vmatpush3.msra.mxu1 %v2098_v50 }
  0x7a   : > { %1449 = vmatprep.subr.mxu1 %v2422_v5 }
 0x114   : > { %v447_v52 = vpop.f32.mrf.mxu0 }
 0x115   : > { %v522_v53 = vadd.f32 %v447_v52, %v378_v51 }
 0x116   : > { %v449_v56 = vpop.f32.mrf.mxu0 }
 0x117   : > { %v1278_v54 = vmul.f32 -1.442695, %v522_v53  ;;  %v529_v57 = vadd.f32 %v449_v56, %v379_v55 }
 0x118   : > { %v518_v58 = vpop.f32.mrf.mxu1 }
 0x119   : > { %1599 = vpow2.f32 %v1278_v54  ;;  %v1279_v59 = vmul.f32 -1.442695, %v529_v57  ;;  %v542_v52 = vadd.f32 %v2176_v0, %v518_v58  ;;  %v380_v54 = vld [vmem:[%s377_s20 + $0x10] sm:$0xff]  ;;  %v2440_v58 = vmov 0.0   ;;  %s1099_s20 = sshll.u32 %s1875_s11, 4  ;;  %s2352_s20 = int_to_ptr.vmem [resolvable:$true] %s1099_s20 }
 0x11a   : > { %v1413_v60 = vpop.f32.mrf.mxu1  ;;  %s1639_s11 = scalar_lea.vmem %s2352_s20, 512 }
 0x11b   : > { %1601 = vpow2.f32 %v1279_v59  ;;  %p1640_p1 = scmp.ne.s32.totalorder %s2352_s20, %s1639_s11 }
 0x11d   : > { %p1641_p2 = pnand %p1640_p1, %p1826_p5 }
 0x11f   : > { %p1642_p3 = pneg %p1641_p2 }
 0x126   : > { %v1600_v61 = vpop.eup %1599 }
 0x127   : > { %v526_v62 = vadd.f32 1.0, %v1600_v61 }
 0x128   : > { %v1602_v63 = vpop.eup %1601 }
 0x129   : > { %1603 = vrcp.f32 %v526_v62  ;;  %v533_v51 = vadd.f32 1.0, %v1602_v63 }
 0x12b   : > { %1605 = vrcp.f32 %v533_v51 }
 0x136   : > { %v1604_v53 = vpop.eup %1603 }
 0x137   : > { %v543_v55 = vmul.f32 %v1604_v53, %v542_v52 }
 0x138   : > { %v1606_v57 = vpop.eup %1605 }
 0x139   : > { %v544_v56 = vadd.f32 %v543_v55, %v380_v54  ;;  %v546_v59 = vsub.f32 1.0, %v1606_v57  ;;  %v548_v62 = vmul.f32 %v1606_v57, %v2067_v45  ;;  %v1282_v45 = vld [vmem:[%s1173_s28 + $0x18] sm:$0xff]  ;;  %v1283_v55 = vld [vmem:[%s1173_s28 + $0x20] sm:$0xff] }
 0x13b   : > { %1607 = vtanh.f32 %v544_v56 }
 0x148   : > { %v1608_v60 = vpop.eup %1607 }
 0x149   : > { %v547_v61 = vmul.f32 %v1608_v60, %v546_v59 }
 0x14b   : > { %v2184_v5 = vadd.f32 %v548_v62, %v547_v61 }
 0x14d   : > { %625 = vmatmul.mubr.f32.vlgmr.msra.gmra.mxu0 %v2184_v5  ;;  %1447 = vmatmul.mubr.f32.vlgmr.msra.gmra.mxu1 %v2184_v5  ;;  %552 = vst [vmem:[%s551_s23] sm:$0xff] %v2184_v5  ;;  %s2350_s23 = scalar_lea.hbm %s2412_s3, %s1305_s18 }
 0x14e   : > { %734 = vmatpush1.msra.mxu0 %v1883_v2  ;;  %1450 = vmatpush3.msra.mxu1 %v1933_v15 }
 0x14f   : > { %735 = vmatprep.subr.mxu0 %v1886_v3  ;;  %1451 = vmatprep.subr.mxu1 %v2440_v58 }
 0x150   : > { %736 = vmatpush1.msra.mxu0 %v1890_v4  ;;  %1452 = vmatpush3.msra.mxu1 %v1941_v17 }
 0x151   : > { %737 = vmatprep.subr.mxu0 %v1895_v6  ;;  %1453 = vmatprep.subr.mxu1 %v2440_v58 }
 0x152   : > { %738 = vmatpush1.msra.mxu0 %v1900_v7  ;;  %1454 = vmatpush3.msra.mxu1 %v1949_v19 }
 0x153   : > { %739 = vmatprep.subr.mxu0 %v1906_v8  ;;  %1455 = vmatprep.subr.mxu1 %v2440_v58 }
 0x154   : > { %740 = vmatpush1.msra.mxu0 %v1910_v9  ;;  %1456 = vmatpush3.msra.mxu1 %v1962_v22 }
 0x155   : > { %741 = vmatprep.subr.mxu0 %v1914_v10  ;;  %1457 = vmatprep.subr.mxu1 %v2440_v58 }
 0x156   : > { %742 = vmatpush1.msra.mxu0 %v1918_v11  ;;  %1458 = vmatpush3.msra.mxu1 %v1975_v25 }
 0x157   : > { %743 = vmatprep.subr.mxu0 %v1922_v12  ;;  %1459 = vmatprep.subr.mxu1 %v2440_v58 }
 0x158   : > { %744 = vmatpush1.msra.mxu0 %v1926_v13  ;;  %1460 = vmatpush3.msra.mxu1 %v1988_v28 }
 0x159   : > { %745 = vmatprep.subr.mxu0 %v1930_v14  ;;  %1461 = vmatprep.subr.mxu1 %v2440_v58 }
 0x15a   : > { %746 = vmatpush1.msra.mxu0 %v1937_v16  ;;  %1462 = vmatpush3.msra.mxu1 %v2001_v31 }
 0x15b   : > { %747 = vmatprep.subr.mxu0 %v1945_v18  ;;  %1463 = vmatprep.subr.mxu1 %v2440_v58 }
 0x15c   : > { %748 = vmatpush1.msra.mxu0 %v1953_v20  ;;  %1464 = vmatpush3.msra.mxu1 %v2014_v34 }
 0x15d   : > { %749 = vmatprep.subr.mxu0 %v1958_v21  ;;  %1465 = vmatprep.subr.mxu1 %v2440_v58 }
 0x15e   : > { %750 = vmatpush1.msra.mxu0 %v1966_v23  ;;  %1466 = vmatpush3.msra.mxu1 %v2028_v37 }
 0x15f   : > { %751 = vmatprep.subr.mxu0 %v1971_v24  ;;  %1467 = vmatprep.subr.mxu1 %v2440_v58 }
 0x160   : > { %752 = vmatpush1.msra.mxu0 %v1979_v26  ;;  %1468 = vmatpush3.msra.mxu1 %v2041_v40 }
 0x161   : > { %753 = vmatprep.subr.mxu0 %v1984_v27  ;;  %1469 = vmatprep.subr.mxu1 %v2440_v58 }
 0x162   : > { %754 = vmatpush1.msra.mxu0 %v1992_v29  ;;  %1470 = vmatpush3.msra.mxu1 %v2054_v43 }
 0x163   : > { %755 = vmatprep.subr.mxu0 %v1997_v30  ;;  %1471 = vmatprep.subr.mxu1 %v2440_v58 }
 0x164   : > { %756 = vmatpush1.msra.mxu0 %v2005_v32  ;;  %1472 = vmatpush3.msra.mxu1 %v2071_v46 }
 0x165   : > { %757 = vmatprep.subr.mxu0 %v2010_v33  ;;  %1473 = vmatprep.subr.mxu1 %v2440_v58 }
 0x166   : > { %758 = vmatpush1.msra.mxu0 %v2018_v35  ;;  %1474 = vmatpush3.msra.mxu1 %v2078_v47 }
 0x167   : > { %759 = vmatprep.subr.mxu0 %v2023_v36  ;;  %1475 = vmatprep.subr.mxu1 %v2440_v58 }
 0x168   : > { %760 = vmatpush1.msra.mxu0 %v2032_v38  ;;  %1476 = vmatpush3.msra.mxu1 %v2084_v48 }
 0x169   : > { %761 = vmatprep.subr.mxu0 %v2037_v39  ;;  %1477 = vmatprep.subr.mxu1 %v2440_v58 }
 0x16a   : > { %762 = vmatpush1.msra.mxu0 %v2045_v41  ;;  %1478 = vmatpush3.msra.mxu1 %v2091_v49 }
 0x16b   : > { %763 = vmatprep.subr.mxu0 %v2050_v42  ;;  %1479 = vmatprep.subr.mxu1 %v2440_v58  ;;  %v1284_v42 = vld [vmem:[%s1173_s28 + $0x28] sm:$0xff]  ;;  %s1736_s28 = smov [#allocation3]  }
 0x16c   : > { %764 = vmatpush1.msra.mxu0 %v2058_v44  ;;  %797 = vmatprep.mubr.f32.mxu0 %v2440_v58 }
 0x16d   : > { %1480 = vmatpush3.msra.mxu1 %v2098_v50  ;;  %1481 = vmatprep.mubr.msk.f32.mxu1 %vm1735_vm0, %v2440_v58 }
 0x16e   : > { %907 = vmatprep.subr.mxu0 %v1880_v1  ;;  %1484 = vmatprep.subr.mxu1 %v2440_v58 }
 0x20d   : > { %v626_v63 = vpop.f32.mrf.mxu0  ;;  %v697_v51 = vpop.f32.mrf.mxu1 }
 0x20e   : > { %v701_v52 = vadd.f32 %v1282_v45, %v626_v63  ;;  %v715_v50 = vadd.f32 %v2176_v0, %v697_v51 }
 0x20f   : > { %v1448_v53 = vpop.f32.mrf.mxu1  ;;  %v628_v56 = vpop.f32.mrf.mxu0 }
 0x210   : > { %v1285_v54 = vmul.f32 -1.442695, %v701_v52  ;;  %v708_v57 = vadd.f32 %v1283_v55, %v628_v56 }
 0x212   : > { %1609 = vpow2.f32 %v1285_v54  ;;  %v1286_v59 = vmul.f32 -1.442695, %v708_v57 }
 0x214   : > { %1611 = vpow2.f32 %v1286_v59 }
 0x21f   : > { %v1610_v60 = vpop.eup %1609 }
 0x220   : > { %v705_v61 = vadd.f32 1.0, %v1610_v60 }
 0x221   : > { %v1612_v1 = vpop.eup %1611 }
 0x222   : > { %1613 = vrcp.f32 %v705_v61  ;;  %v712_v62 = vadd.f32 1.0, %v1612_v1 }
 0x224   : > { %1615 = vrcp.f32 %v712_v62 }
 0x22f   : > { %v1614_v44 = vpop.eup %1613 }
 0x230   : > { %v716_v45 = vmul.f32 %v1614_v44, %v715_v50 }
 0x231   : > { %v1616_v52 = vpop.eup %1615 }
 0x232   : > { %v717_v63 = vadd.f32 %v1284_v42, %v716_v45  ;;  %v719_v53 = vsub.f32 1.0, %v1616_v52  ;;  %v721_v56 = vmul.f32 %v1616_v52, %v2184_v5  ;;  %v730_v5 = vld [vmem:[%s729_s14] sm:$0xff] }
 0x234   : > { %1617 = vtanh.f32 %v717_v63 }
 0x241   : > { %v1618_v54 = vpop.eup %1617 }
 0x242   : > { %v720_v55 = vmul.f32 %v1618_v54, %v719_v53 }
 0x244   : > { %v2264_v57 = vadd.f32 %v721_v56, %v720_v55 }
 0x246   : > { %1288 = vst [vmem:[%s1176_s7 + $0x8] sm:$0xff] %v2264_v57  ;;  %798 = vmatmul.mubr.f32.vlgmr.msra.gmra.mxu0 %v2264_v57  ;;  %1482 = vmatmul.mubr.f32.vlgmr.msra.gmra.mxu1 %v2264_v57  ;;  %s1643_s7 = sshll.u32 %s1736_s28, 4  ;;  %s1644_s7 = int_to_ptr.vmem [resolvable:$false] %s1643_s7 }
 0x247   : > { %908 = vmatpush1.msra.mxu0 %v1883_v2  ;;  %1485 = vmatpush3.msra.mxu1 %v1933_v15  ;;  %v2441_v2 = vld [vmem:[#allocation14_spill] sm:$0xff]  ;;  %s1645_s8 = scalar_lea.vmem %s1644_s7, 1024  ;;  %p1646_p4 = scmp.lt.s32.totalorder %s2352_s20, %s1644_s7 }
 0x248   : > { %909 = vmatprep.subr.mxu0 %v1886_v3  ;;  %1486 = vmatprep.subr.mxu1 %v2440_v58  ;;  %v2442_v3 = vld [vmem:[#allocation15_spill] sm:$0xff]  ;;  %p1647_p6 = scmp.lt.s32.totalorder %s1645_s8, %s1639_s11 }
 0x249   : > { %910 = vmatpush1.msra.mxu0 %v1890_v4  ;;  %1487 = vmatpush3.msra.mxu1 %v1941_v17  ;;  %v2443_v4 = vld [vmem:[#allocation16_spill] sm:$0xff] }
 0x24a   : > { %911 = vmatprep.subr.mxu0 %v1895_v6  ;;  %1488 = vmatprep.subr.mxu1 %v2440_v58  ;;  %p1648_p7 = por %p1647_p6, %p1646_p4 }
 0x24b   : > { %912 = vmatpush1.msra.mxu0 %v1900_v7  ;;  %1489 = vmatpush3.msra.mxu1 %v1949_v19 }
 0x24c   : > { %913 = vmatprep.subr.mxu0 %v1906_v8  ;;  %1490 = vmatprep.subr.mxu1 %v2440_v58  ;;  %p1649_p9 = pnand %p1648_p7, %p1642_p3 }
 0x24d   : > { %914 = vmatpush1.msra.mxu0 %v1910_v9  ;;  %1491 = vmatpush3.msra.mxu1 %v1962_v22 }
 0x24e   : > { %915 = vmatprep.subr.mxu0 %v1914_v10  ;;  %1492 = vmatprep.subr.mxu1 %v2440_v58 }
 0x24f   : > { %916 = vmatpush1.msra.mxu0 %v1918_v11  ;;  %1493 = vmatpush3.msra.mxu1 %v1975_v25  ;;  %v731_v11 = vld [vmem:[%s729_s14 + $0x8] sm:$0xff] }
 0x250   : > { %917 = vmatprep.subr.mxu0 %v1922_v12  ;;  %1494 = vmatprep.subr.mxu1 %v2440_v58 }
 0x251   : > { %918 = vmatpush1.msra.mxu0 %v1926_v13  ;;  %1495 = vmatpush3.msra.mxu1 %v1988_v28 }
 0x252   : > { %919 = vmatprep.subr.mxu0 %v1930_v14  ;;  %1496 = vmatprep.subr.mxu1 %v2440_v58 }
 0x253   : > { %920 = vmatpush1.msra.mxu0 %v1937_v16  ;;  %1497 = vmatpush3.msra.mxu1 %v2001_v31 }
 0x254   : > { %921 = vmatprep.subr.mxu0 %v1945_v18  ;;  %1498 = vmatprep.subr.mxu1 %v2440_v58 }
 0x255   : > { %922 = vmatpush1.msra.mxu0 %v1953_v20  ;;  %1499 = vmatpush3.msra.mxu1 %v2014_v34 }
 0x256   : > { %923 = vmatprep.subr.mxu0 %v1958_v21  ;;  %1500 = vmatprep.subr.mxu1 %v2440_v58  ;;  %v732_v21 = vld [vmem:[%s729_s14 + $0x10] sm:$0xff] }
 0x257   : > { %924 = vmatpush1.msra.mxu0 %v1966_v23  ;;  %1501 = vmatpush3.msra.mxu1 %v2028_v37 }
 0x258   : > { %925 = vmatprep.subr.mxu0 %v1971_v24  ;;  %1502 = vmatprep.subr.mxu1 %v2440_v58 }
 0x259   : > { %926 = vmatpush1.msra.mxu0 %v1979_v26  ;;  %1503 = vmatpush3.msra.mxu1 %v2041_v40 }
 0x25a   : > { %927 = vmatprep.subr.mxu0 %v1984_v27  ;;  %1504 = vmatprep.subr.mxu1 %v2440_v58 }
 0x25b   : > { %928 = vmatpush1.msra.mxu0 %v1992_v29  ;;  %1505 = vmatpush3.msra.mxu1 %v2054_v43 }
 0x25c   : > { %929 = vmatprep.subr.mxu0 %v1997_v30  ;;  %1506 = vmatprep.subr.mxu1 %v2440_v58  ;;  %v1294_v30 = vld [vmem:[%s1184_s24 + $0x48] sm:$0xff] }
 0x25d   : > { %930 = vmatpush1.msra.mxu0 %v2005_v32  ;;  %1507 = vmatpush3.msra.mxu1 %v2071_v46 }
 0x25e   : > { %931 = vmatprep.subr.mxu0 %v2010_v33  ;;  %1508 = vmatprep.subr.mxu1 %v2440_v58 }
 0x25f   : > { %932 = vmatpush1.msra.mxu0 %v2018_v35  ;;  %1509 = vmatpush3.msra.mxu1 %v2078_v47  ;;  %v1296_v47 = vld [vmem:[%s1184_s24 + $0x58] sm:$0xff] }
 0x260   : > { %933 = vmatprep.subr.mxu0 %v2023_v36  ;;  %1510 = vmatprep.subr.mxu1 %v2440_v58  ;;  %v1295_v36 = vld [vmem:[%s1184_s24 + $0x50] sm:$0xff] }
 0x261   : > { %934 = vmatpush1.msra.mxu0 %v2032_v38  ;;  %1511 = vmatpush3.msra.mxu1 %v2084_v48 }
 0x262   : > { %935 = vmatprep.subr.mxu0 %v2037_v39  ;;  %1512 = vmatprep.subr.mxu1 %v2440_v58 }
 0x263   : > { %936 = vmatpush1.msra.mxu0 %v2045_v41  ;;  %1513 = vmatpush3.msra.mxu1 %v2091_v49 }
 0x264   : > { %937 = vmatprep.subr.mxu0 %v2441_v2  ;;  %1514 = vmatprep.subr.mxu1 %v2440_v58 }
 0x265   : > { %938 = vmatpush1.msra.mxu0 %v2442_v3  ;;  %971 = vmatprep.mubr.f32.mxu0 %v2440_v58 }
 0x266   : > { %1515 = vmatpush3.msra.mxu1 %v2443_v4  ;;  %1516 = vmatprep.mubr.msk.f32.mxu1 %vm1735_vm0, %v2440_v58 }
 0x306   : > { %v799_v6 = vpop.f32.mrf.mxu0  ;;  %v870_v7 = vpop.f32.mrf.mxu1 }
 0x307   : > { %v874_v8 = vadd.f32 %v799_v6, %v730_v5  ;;  %v888_v19 = vadd.f32 %v2176_v0, %v870_v7 }
 0x308   : > { %v1483_v9 = vpop.f32.mrf.mxu1  ;;  %v801_v12 = vpop.f32.mrf.mxu0 }
 0x309   : > { %v1290_v10 = vmul.f32 -1.442695, %v874_v8  ;;  %v881_v13 = vadd.f32 %v801_v12, %v731_v11 }
 0x30b   : > { %1619 = vpow2.f32 %v1290_v10  ;;  %v1291_v14 = vmul.f32 -1.442695, %v881_v13 }
 0x30d   : > { %1621 = vpow2.f32 %v1291_v14 }
 0x318   : > { %v1620_v15 = vpop.eup %1619 }
 0x319   : > { %v878_v16 = vadd.f32 1.0, %v1620_v15 }
 0x31a   : > { %v1622_v17 = vpop.eup %1621 }
 0x31b   : > { %1623 = vrcp.f32 %v878_v16  ;;  %v885_v18 = vadd.f32 1.0, %v1622_v17 }
 0x31d   : > { %1625 = vrcp.f32 %v885_v18 }
 0x328   : > { %v1624_v20 = vpop.eup %1623 }
 0x329   : > { %v889_v22 = vmul.f32 %v1624_v20, %v888_v19 }
 0x32a   : > { %v1626_v24 = vpop.eup %1625 }
 0x32b   : > { %v890_v23 = vadd.f32 %v889_v22, %v732_v21  ;;  %v892_v25 = vsub.f32 1.0, %v1626_v24  ;;  %v894_v28 = vmul.f32 %v1626_v24, %v2264_v57 }
 0x32d   : > { %1627 = vtanh.f32 %v890_v23 }
 0x33a   : > { %v1628_v26 = vpop.eup %1627 }
 0x33b   : > { %v893_v27 = vmul.f32 %v1628_v26, %v892_v25 }
 0x33d   : > { %v895_v29 = vadd.f32 %v894_v28, %v893_v27 }
 0x33f   : > { %898 = vst [vmem:[%s897_s30] sm:$0xff] %v895_v29  ;;  %972 = vmatmul.mubr.f32.vlgmr.msra.gmra.mxu0 %v895_v29  ;;  %1517 = vmatmul.mubr.f32.vlgmr.msra.gmra.mxu1 %v895_v29 }
 0x3ff   : > { %v973_v31 = vpop.f32.mrf.mxu0  ;;  %v1044_v32 = vpop.f32.mrf.mxu1 }
 0x400   : > { %v1048_v33 = vadd.f32 %v1294_v30, %v973_v31  ;;  %v1062_v44 = vadd.f32 %v2176_v0, %v1044_v32 }
 0x401   : > { %v1518_v34 = vpop.f32.mrf.mxu1  ;;  %v975_v37 = vpop.f32.mrf.mxu0 }
 0x402   : > { %v1297_v35 = vmul.f32 -1.442695, %v1048_v33  ;;  %v1055_v38 = vadd.f32 %v1295_v36, %v975_v37 }
 0x404   : > { %1629 = vpow2.f32 %v1297_v35  ;;  %v1298_v39 = vmul.f32 -1.442695, %v1055_v38 }
 0x406   : > { %1631 = vpow2.f32 %v1298_v39 }
 0x411   : > { %v1630_v40 = vpop.eup %1629 }
 0x412   : > { %v1052_v41 = vadd.f32 1.0, %v1630_v40 }
 0x413   : > { %v1632_v42 = vpop.eup %1631 }
 0x414   : > { %1633 = vrcp.f32 %v1052_v41  ;;  %v1059_v43 = vadd.f32 1.0, %v1632_v42 }
 0x416   : > { %1635 = vrcp.f32 %v1059_v43 }
 0x421   : > { %v1634_v46 = vpop.eup %1633 }
 0x422   : > { %v1063_v48 = vmul.f32 %v1634_v46, %v1062_v44 }
 0x423   : > { %v1636_v50 = vpop.eup %1635 }
 0x424   : > { %v1064_v49 = vadd.f32 %v1296_v47, %v1063_v48  ;;  %v1066_v58 = vsub.f32 1.0, %v1636_v50  ;;  %v1068_v59 = vmul.f32 %v1636_v50, %v895_v29 }
 0x426   : > { %1637 = vtanh.f32 %v1064_v49 }
 0x433   : > { %v1638_v51 = vpop.eup %1637 }
 0x434   : > { %v1067_v0 = vmul.f32 %v1638_v51, %v1066_v58 }
 0x436   : > { %v1069_v60 = vadd.f32 %v1068_v59, %v1067_v0 }
 0x438   : > { %1073 = vst [vmem:[%s2064_s17] sm:$0xff] %v1069_v60  ;;  %1074 = vst [vmem:[%s1863_s26] sm:$0xff] %v1069_v60 }
 0x439   : > { %1300 = vst [vmem:[%s1188_s21 + $0x18] sm:$0xff] %v1069_v60 }
 0x43a   : > { %1652 = shalt.err (!%p1649_p9)
}
 0x43b   : > { %s1653_s26 = scalar_lea.hbm %s2350_s23, 512  ;;  %s1657_s14 = scalar_lea.hbm %s2412_s3, 2048 }
 0x43c   : > { %p1654_p10 = scmp.ne.s32.totalorder %s2350_s23, %s1653_s26  ;;  %p1658_p13 = scmp.lt.s32.totalorder %s2350_s23, %s2412_s3 }
 0x43d   : > { %p1659_p0 = scmp.lt.s32.totalorder %s1657_s14, %s1653_s26 }
 0x43e   : > { %p1655_p11 = pnand %p1654_p10, %p1826_p5 }
 0x43f   : > { %p1660_p1 = por %p1659_p0, %p1658_p13 }
 0x440   : > { %p1656_p12 = pneg %p1655_p11 }
 0x442   : > { %p1661_p2 = pnand %p1660_p1, %p1656_p12 }
 0x444   : > { %1664 = shalt.err (!%p1661_p2)
}
 0x445   : > { %s1737_s5 = smov 128   ;;  %s1738_s24 = smov 256  }
 0x446   : > { %s1739_s9 = smov 8  }
 0x447   : > { %1522 = dma.vmem_to_hbm [thread:$0]  (%p1826_p5), %s2352_s20, 512, %s2350_s23, %s2358_s6, %s1737_s5, %s1738_s24, %s1739_s9  }
 0x448 PF: > { %s2445_s29 = sld [smem:[#allocation6_spill]]  ;;  %p1528_p3 = scmp.ge.s32.totalorder %s1731_s22, 2 }
 0x44a   : > { %p1525_p4 = pnand %p1528_p3, %p1832_p8 }
 0x44c   : > { %p1526_p6 = pneg %p1525_p4 }
 0x44e   : > { %s1117_s18 = sand.u32 1, %s2445_s29  }
 0x44f   : > { %s1118_s21 = scalar_lea.sflag [#allocation4], %s1117_s18 }
 0x450   : > { %1698 = dma.done.wait (%p1526_p6), %s1118_s21, 512  }
 0x451   : > { %1700 = vsyncadd (%p1526_p6), %s1118_s21, 4294966784  ;;  %s18_s22 = sadd.s32 1, %s1731_s22   ;;  %s2447_s25 = sld [smem:[#allocation7_spill]] }
 0x452   : > { %p15_p7 = scmp.ge.s32.totalorder %s18_s22, 6   ;;  %s2448_s17 = sld [smem:[#allocation13_spill]] }
 0x453   : > { %s2449_s18 = sld [smem:[#allocation8_spill]]  ;;  %s2453_s15 = smov %s1707_s16 }
 0x454   : > { %s2450_s19 = sld [smem:[#allocation9_spill]]  ;;  %17 = sbr.rel (!%p15_p7) target bundleno = 5 (0x5), region = 99 }
 0x455   : > { %s2451_s20 = sld [smem:[#allocation10_spill]] }
 0x456   : > { %s2452_s21 = sld [smem:[#allocation11_spill]] }
 0x457   : > { %s2454_s16 = smov %s2447_s25 }
 0x459   :  { %1130 = vsyncpa [#allocation4], 1 }
 0x45a   :  { %1132 = vsyncpa [#allocation4 + $0x1], 1 }

</bundles_post_ra>
